<compile_context>
chip_gen: v7x
topology: tpu7x:2x2x1
jax: 0.10.0
libtpu: 0.0.40
codegen_flags: <defaults>
</compile_context>

<pallas_src>
import functools

import jax
import jax.numpy as jnp
import numpy as np
from jax.experimental import pallas as pl
from jax.experimental.pallas import tpu as pltpu


# ---------------------------------------------------------------------------
# GELU (PyTorch nn.GELU() default, exact erf) with trimmed VALU op count.
#
#   gelu(x) = 0.5*x*(1 + erf(x/sqrt(2)))
#           = relu(x) - |x| * P(t) * exp(-x^2/2),   t = 1/(1 + c*|x|)
#
# where c = 0.3275911/sqrt(2) and P is the A&S 7.1.26 polynomial with the 0.5
# factor folded into its coefficients (max abs erf err ~1.5e-7 before the
# approx reciprocal).
# ---------------------------------------------------------------------------
_ERF_C = 0.3275911 * 0.7071067811865476


def _gelu_f32(x):
    a = jnp.abs(x)
    t = pl.reciprocal(1.0 + _ERF_C * a, approx=True)      # EUP slot, not VALU
    p = t * (0.127414796
             + t * (-0.142248368
                    + t * (0.7107068705
                           + t * (-0.7265760135 + t * 0.5307027145))))
    return jnp.maximum(x, 0.0) - a * p * jnp.exp(-0.5 * (x * x))   # exp -> EUP


# ---------------------------------------------------------------------------
# Kernel: one row-tile of tokens, hidden dim split into static chunks.
# ---------------------------------------------------------------------------
def mlp_kernel(x_ref, w1_ref, b1_ref, w2_ref, b2_ref, o_ref, *, dh_chunk, n_chunks):
    x = x_ref[...]                                          # (TM, Din) bf16
    # Seed the f32 output block with the fc2 bias; chunks accumulate into it.
    o_ref[...] = jnp.broadcast_to(b2_ref[...], o_ref.shape)

    # Static offsets -> zero-cost static ref views; fully unrolled straight-line
    # code so the LLO scheduler can overlap chunk c's GELU with chunk c+1's matmul.
    for c in range(n_chunks):
        lo = c * dh_chunk
        hi = lo + dh_chunk
        h = jnp.dot(x, w1_ref[:, lo:hi],
                    preferred_element_type=jnp.float32)     # (TM, chunk) f32
        h = _gelu_f32(h + b1_ref[:, lo:hi])
        o_ref[...] += jnp.dot(h.astype(jnp.bfloat16), w2_ref[lo:hi, :],
                              preferred_element_type=jnp.float32)


def _round_up(v, m):
    return (v + m - 1) // m * m


def mlp_forward(x, w1, b1, w2, b2, *, tm_cap=256):
    """x: (..., Din).  w1: (Din, Dh), b1: (Dh,), w2: (Dh, Dout), b2: (Dout,).
    Weights are ideally pre-cast to bf16 once (hoisted); drop=0.0 -> identity.
    Returns (..., Dout) float32."""
    orig_shape = x.shape
    din = orig_shape[-1]
    dh = w1.shape[1]
    dout = w2.shape[1]

    # Input tokens as one (M, Din) bf16 slab: half the HBM DMA, MXU-native.
    xf = x.reshape(-1, din)
    if xf.dtype != jnp.bfloat16:
        xf = xf.astype(jnp.bfloat16)
    m = xf.shape[0]

    # Weights: cast only if the caller did not already store them in bf16.
    w1b = w1 if w1.dtype == jnp.bfloat16 else w1.astype(jnp.bfloat16)
    w2b = w2 if w2.dtype == jnp.bfloat16 else w2.astype(jnp.bfloat16)
    b1f = b1.reshape(1, dh).astype(jnp.float32)
    b2f = b2.reshape(1, dout).astype(jnp.float32)

    # Row tile: multiple of 8 (sublane), capped at tm_cap. No slab-wide jnp.pad:
    # a partial last tile is masked by Pallas on the output store.
    tm = min(tm_cap, _round_up(m, 8))
    grid_m = pl.cdiv(m, tm)

    # Hidden-dim chunk: largest of 512/256/128 that divides Dh, preferring >=2
    # chunks so MXU work of one chunk can hide the GELU of another.
    chunk = dh
    for cand in (512, 256, 128):
        if dh % cand == 0 and dh // cand >= 2:
            chunk = cand
            break
    else:
        for cand in (512, 256, 128):
            if dh % cand == 0:
                chunk = cand
                break
    n_chunks = dh // chunk

    # VMEM budget: resident bf16 weights (double-buffered by default), double-
    # buffered x/out tiles, in-flight f32 hidden-chunk temporaries, biases.
    est = (2 * 2 * (din * dh + dh * dout)
           + 2 * 2 * tm * din
           + 2 * 4 * tm * dout
           + 3 * 4 * tm * chunk
           + 4 * 2 * (dh + dout))
    vmem_limit = 2 * est + (2 << 20)
    vmem_limit = max(vmem_limit, 32 << 20)   # above the 16/32 MiB scoped default
    vmem_limit = min(vmem_limit, 48 << 20)   # headroom under v7x's 64 MiB per TC
    # TODO(synk): for very large Dh (resident bf16 weights > ~20 MiB) move Dh to an
    # "arbitrary" grid axis with a pl.when-initialized accumulator instead of
    # keeping both weight matrices fully resident.

    def _resident(shape):
        # Block index never changes -> stays in VMEM across the whole grid.
        return pl.BlockSpec(shape, lambda *_: (0,) * len(shape))

    kernel = functools.partial(mlp_kernel, dh_chunk=chunk, n_chunks=n_chunks)

    out = pl.pallas_call(
        kernel,
        out_shape=jax.ShapeDtypeStruct((m, dout), jnp.float32),
        grid_spec=pltpu.PrefetchScalarGridSpec(
            num_scalar_prefetch=0,
            grid=(grid_m,),
            in_specs=[
                pl.BlockSpec((tm, din), lambda i: (i, 0)),   # token tile (bf16)
                _resident((din, dh)),                        # W1
                _resident((1, dh)),                          # b1
                _resident((dh, dout)),                       # W2
                _resident((1, dout)),                        # b2
            ],
            out_specs=pl.BlockSpec((tm, dout), lambda i: (i, 0)),
        ),
        compiler_params=pltpu.CompilerParams(
            dimension_semantics=("parallel",),
            vmem_limit_bytes=int(vmem_limit)),
        cost_estimate=pl.CostEstimate(
            flops=2 * m * (din * dh + dh * dout),
            transcendentals=2 * m * dh,                      # exp + reciprocal
            bytes_accessed=(m * din * 2 + din * dh * 2 + dh * dout * 2
                            + dh * 4 + dout * 4 + m * dout * 4)),
    )(xf, w1b, b1f, w2b, b2f)

    return out.reshape(*orig_shape[:-1], dout)


def ref_forward(x, w1, b1, w2, b2):
    """Plain-JAX reference mirroring the PyTorch Mlp forward (drop=0.0)."""
    h = jnp.einsum("...d,dh->...h", x.astype(jnp.float32), w1) + b1
    h = jax.nn.gelu(h, approximate=False)      # exact erf GELU (PyTorch default)
    return jnp.einsum("...h,ho->...o", h, w2) + b2


if __name__ == "__main__":
    # Mlp(in_features=128, hidden_features=512) on a (2, 8, 128) token tensor.
    B, N = 2, 8
    Din, Dh, Dout = 128, 512, 128              # lane-dense feature dims

    key = jax.random.PRNGKey(0)
    ks = jax.random.split(key, 5)

    def rn(k, shape, scale=0.05):
        return (scale * jax.random.normal(k, shape)).astype(jnp.float32)

    x = jax.random.normal(ks[0], (B, N, Din), dtype=jnp.float32)
    w1 = rn(ks[1], (Din, Dh))
    b1 = rn(ks[2], (Dh,))
    w2 = rn(ks[3], (Dh, Dout))
    b2 = rn(ks[4], (Dout,))

    # Hoisted one-time bf16 weight cast (a real model stores params in bf16 once,
    # instead of paying an HBM round trip on every forward call).
    w1_bf16 = w1.astype(jnp.bfloat16)
    w2_bf16 = w2.astype(jnp.bfloat16)

    out = jax.block_until_ready(mlp_forward(x, w1_bf16, b1, w2_bf16, b2))
    ref = jax.block_until_ready(ref_forward(x, w1, b1, w2, b2))

    assert out.shape == (B, N, Dout) and out.dtype == jnp.float32
    np.testing.assert_allclose(np.asarray(out), np.asarray(ref), rtol=2e-2, atol=2e-2)
    print("KERNEL_OK")
</pallas_src>

<mosaic_0001>
module attributes {stable_mosaic.version = 11 : i64} {
  func.func @mlp_kernel(%arg0: i32, %arg1: memref<16x128xbf16, #tpu.memory_space<vmem>>, %arg2: memref<128x512xbf16, #tpu.memory_space<vmem>>, %arg3: memref<1x512xf32, #tpu.memory_space<vmem>>, %arg4: memref<512x128xbf16, #tpu.memory_space<vmem>>, %arg5: memref<1x128xf32, #tpu.memory_space<vmem>>, %arg6: memref<16x128xf32, #tpu.memory_space<vmem>>) attributes {dimension_semantics = [#tpu.dimension_semantics<parallel>], iteration_bounds = array<i64: 1>, scalar_prefetch = 0 : i64, scratch_operands = 0 : i64, tpu.core_type = #tpu.core_type<tc>, window_params = [{transform_indices = @transform_0, window_bounds = array<i64: 16, 128>}, {pipeline_mode = #tpu.pipeline_mode<synchronous>, transform_indices = @transform_1, window_bounds = array<i64: 128, 512>}, {pipeline_mode = #tpu.pipeline_mode<synchronous>, transform_indices = @transform_2, window_bounds = array<i64: 1, 512>}, {pipeline_mode = #tpu.pipeline_mode<synchronous>, transform_indices = @transform_3, window_bounds = array<i64: 512, 128>}, {pipeline_mode = #tpu.pipeline_mode<synchronous>, transform_indices = @transform_4, window_bounds = array<i64: 1, 128>}, {transform_indices = @transform_5, window_bounds = array<i64: 16, 128>}]} {
    %c0 = arith.constant 0 : index
    %c0_0 = arith.constant 0 : index
    %0 = vector.load %arg1[%c0, %c0_0] : memref<16x128xbf16, #tpu.memory_space<vmem>>, vector<16x128xbf16>
    %c0_1 = arith.constant 0 : index
    %c0_2 = arith.constant 0 : index
    %1 = vector.load %arg5[%c0_1, %c0_2] : memref<1x128xf32, #tpu.memory_space<vmem>>, vector<1x128xf32>
    %2 = vector.shape_cast %1 : vector<1x128xf32> to vector<1x128xf32>
    %3 = vector.broadcast %2 : vector<1x128xf32> to vector<16x128xf32>
    %c0_3 = arith.constant 0 : index
    %c0_4 = arith.constant 0 : index
    %4 = vector.load %arg6[%c0_3, %c0_4] : memref<16x128xf32, #tpu.memory_space<vmem>>, vector<16x128xf32>
    tpu.vector_store %arg6[%c0_3, %c0_4], %3 {strides = array<i32>} : memref<16x128xf32, #tpu.memory_space<vmem>>, vector<16x128xf32>,
    %c0_5 = arith.constant 0 : index
    %c0_6 = arith.constant 0 : index
    %5 = vector.load %arg2[%c0_5, %c0_6] : memref<128x512xbf16, #tpu.memory_space<vmem>>, vector<128x256xbf16>
    %cst = arith.constant dense<0.000000e+00> : vector<16x256xf32>
    %6 = tpu.matmul %0, %5, %cst {dimension_numbers = #tpu.dot_dimension_numbers<[1], [0], [0], [1], [0, 0, 1, 1], [], []>} : vector<16x128xbf16>, vector<128x256xbf16>, vector<16x256xf32> -> vector<16x256xf32>
    %c0_7 = arith.constant 0 : index
    %c0_8 = arith.constant 0 : index
    %7 = vector.load %arg3[%c0_7, %c0_8] : memref<1x512xf32, #tpu.memory_space<vmem>>, vector<1x256xf32>
    %8 = vector.broadcast %7 : vector<1x256xf32> to vector<16x256xf32>
    %9 = arith.addf %6, %8 : vector<16x256xf32>
    %10 = math.absf %9 : vector<16x256xf32>
    %cst_9 = arith.constant 0.231641889 : f32
    %11 = vector.broadcast %cst_9 : f32 to vector<16x256xf32>
    %12 = arith.mulf %11, %10 : vector<16x256xf32>
    %cst_10 = arith.constant 1.000000e+00 : f32
    %13 = vector.broadcast %cst_10 : f32 to vector<16x256xf32>
    %14 = arith.addf %13, %12 : vector<16x256xf32>
    %15 = tpu.reciprocal %14 {approx = true} : vector<16x256xf32> -> vector<16x256xf32>
    %cst_11 = arith.constant 0.53070271 : f32
    %16 = vector.broadcast %cst_11 : f32 to vector<16x256xf32>
    %17 = arith.mulf %15, %16 : vector<16x256xf32>
    %cst_12 = arith.constant -0.72657603 : f32
    %18 = vector.broadcast %cst_12 : f32 to vector<16x256xf32>
    %19 = arith.addf %18, %17 : vector<16x256xf32>
    %20 = arith.mulf %15, %19 : vector<16x256xf32>
    %cst_13 = arith.constant 0.710706889 : f32
    %21 = vector.broadcast %cst_13 : f32 to vector<16x256xf32>
    %22 = arith.addf %21, %20 : vector<16x256xf32>
    %23 = arith.mulf %15, %22 : vector<16x256xf32>
    %cst_14 = arith.constant -0.142248362 : f32
    %24 = vector.broadcast %cst_14 : f32 to vector<16x256xf32>
    %25 = arith.addf %24, %23 : vector<16x256xf32>
    %26 = arith.mulf %15, %25 : vector<16x256xf32>
    %cst_15 = arith.constant 0.127414793 : f32
    %27 = vector.broadcast %cst_15 : f32 to vector<16x256xf32>
    %28 = arith.addf %27, %26 : vector<16x256xf32>
    %29 = arith.mulf %15, %28 : vector<16x256xf32>
    %cst_16 = arith.constant 0.000000e+00 : f32
    %30 = vector.broadcast %cst_16 : f32 to vector<16x256xf32>
    %31 = arith.maximumf %9, %30 : vector<16x256xf32>
    %32 = arith.mulf %10, %29 : vector<16x256xf32>
    %33 = arith.mulf %9, %9 : vector<16x256xf32>
    %cst_17 = arith.constant -5.000000e-01 : f32
    %34 = vector.broadcast %cst_17 : f32 to vector<16x256xf32>
    %35 = arith.mulf %34, %33 : vector<16x256xf32>
    %36 = math.exp %35 : vector<16x256xf32>
    %37 = arith.mulf %32, %36 : vector<16x256xf32>
    %38 = arith.subf %31, %37 : vector<16x256xf32>
    %c0_18 = arith.constant 0 : index
    %c0_19 = arith.constant 0 : index
    %39 = vector.load %arg6[%c0_18, %c0_19] : memref<16x128xf32, #tpu.memory_space<vmem>>, vector<16x128xf32>
    %40 = arith.truncf %38 : vector<16x256xf32> to vector<16x256xbf16>
    %c0_20 = arith.constant 0 : index
    %c0_21 = arith.constant 0 : index
    %41 = vector.load %arg4[%c0_20, %c0_21] : memref<512x128xbf16, #tpu.memory_space<vmem>>, vector<256x128xbf16>
    %cst_22 = arith.constant dense<0.000000e+00> : vector<16x128xf32>
    %42 = tpu.matmul %40, %41, %cst_22 {dimension_numbers = #tpu.dot_dimension_numbers<[1], [0], [0], [1], [0, 0, 1, 1], [], []>} : vector<16x256xbf16>, vector<256x128xbf16>, vector<16x128xf32> -> vector<16x128xf32>
    %43 = arith.addf %39, %42 : vector<16x128xf32>
    %c0_23 = arith.constant 0 : index
    %c0_24 = arith.constant 0 : index
    %44 = vector.load %arg6[%c0_23, %c0_24] : memref<16x128xf32, #tpu.memory_space<vmem>>, vector<16x128xf32>
    tpu.vector_store %arg6[%c0_23, %c0_24], %43 {strides = array<i32>} : memref<16x128xf32, #tpu.memory_space<vmem>>, vector<16x128xf32>,
    %c0_25 = arith.constant 0 : index
    %c256 = arith.constant 256 : index
    %45 = vector.load %arg2[%c0_25, %c256] : memref<128x512xbf16, #tpu.memory_space<vmem>>, vector<128x256xbf16>
    %cst_26 = arith.constant dense<0.000000e+00> : vector<16x256xf32>
    %46 = tpu.matmul %0, %45, %cst_26 {dimension_numbers = #tpu.dot_dimension_numbers<[1], [0], [0], [1], [0, 0, 1, 1], [], []>} : vector<16x128xbf16>, vector<128x256xbf16>, vector<16x256xf32> -> vector<16x256xf32>
    %c0_27 = arith.constant 0 : index
    %c256_28 = arith.constant 256 : index
    %47 = vector.load %arg3[%c0_27, %c256_28] : memref<1x512xf32, #tpu.memory_space<vmem>>, vector<1x256xf32>
    %48 = vector.broadcast %47 : vector<1x256xf32> to vector<16x256xf32>
    %49 = arith.addf %46, %48 : vector<16x256xf32>
    %50 = math.absf %49 : vector<16x256xf32>
    %cst_29 = arith.constant 0.231641889 : f32
    %51 = vector.broadcast %cst_29 : f32 to vector<16x256xf32>
    %52 = arith.mulf %51, %50 : vector<16x256xf32>
    %cst_30 = arith.constant 1.000000e+00 : f32
    %53 = vector.broadcast %cst_30 : f32 to vector<16x256xf32>
    %54 = arith.addf %53, %52 : vector<16x256xf32>
    %55 = tpu.reciprocal %54 {approx = true} : vector<16x256xf32> -> vector<16x256xf32>
    %cst_31 = arith.constant 0.53070271 : f32
    %56 = vector.broadcast %cst_31 : f32 to vector<16x256xf32>
    %57 = arith.mulf %55, %56 : vector<16x256xf32>
    %cst_32 = arith.constant -0.72657603 : f32
    %58 = vector.broadcast %cst_32 : f32 to vector<16x256xf32>
    %59 = arith.addf %58, %57 : vector<16x256xf32>
    %60 = arith.mulf %55, %59 : vector<16x256xf32>
    %cst_33 = arith.constant 0.710706889 : f32
    %61 = vector.broadcast %cst_33 : f32 to vector<16x256xf32>
    %62 = arith.addf %61, %60 : vector<16x256xf32>
    %63 = arith.mulf %55, %62 : vector<16x256xf32>
    %cst_34 = arith.constant -0.142248362 : f32
    %64 = vector.broadcast %cst_34 : f32 to vector<16x256xf32>
    %65 = arith.addf %64, %63 : vector<16x256xf32>
    %66 = arith.mulf %55, %65 : vector<16x256xf32>
    %cst_35 = arith.constant 0.127414793 : f32
    %67 = vector.broadcast %cst_35 : f32 to vector<16x256xf32>
    %68 = arith.addf %67, %66 : vector<16x256xf32>
    %69 = arith.mulf %55, %68 : vector<16x256xf32>
    %cst_36 = arith.constant 0.000000e+00 : f32
    %70 = vector.broadcast %cst_36 : f32 to vector<16x256xf32>
    %71 = arith.maximumf %49, %70 : vector<16x256xf32>
    %72 = arith.mulf %50, %69 : vector<16x256xf32>
    %73 = arith.mulf %49, %49 : vector<16x256xf32>
    %cst_37 = arith.constant -5.000000e-01 : f32
    %74 = vector.broadcast %cst_37 : f32 to vector<16x256xf32>
    %75 = arith.mulf %74, %73 : vector<16x256xf32>
    %76 = math.exp %75 : vector<16x256xf32>
    %77 = arith.mulf %72, %76 : vector<16x256xf32>
    %78 = arith.subf %71, %77 : vector<16x256xf32>
    %c0_38 = arith.constant 0 : index
    %c0_39 = arith.constant 0 : index
    %79 = vector.load %arg6[%c0_38, %c0_39] : memref<16x128xf32, #tpu.memory_space<vmem>>, vector<16x128xf32>
    %80 = arith.truncf %78 : vector<16x256xf32> to vector<16x256xbf16>
    %c256_40 = arith.constant 256 : index
    %c0_41 = arith.constant 0 : index
    %81 = vector.load %arg4[%c256_40, %c0_41] : memref<512x128xbf16, #tpu.memory_space<vmem>>, vector<256x128xbf16>
    %cst_42 = arith.constant dense<0.000000e+00> : vector<16x128xf32>
    %82 = tpu.matmul %80, %81, %cst_42 {dimension_numbers = #tpu.dot_dimension_numbers<[1], [0], [0], [1], [0, 0, 1, 1], [], []>} : vector<16x256xbf16>, vector<256x128xbf16>, vector<16x128xf32> -> vector<16x128xf32>
    %83 = arith.addf %79, %82 : vector<16x128xf32>
    %c0_43 = arith.constant 0 : index
    %c0_44 = arith.constant 0 : index
    %84 = vector.load %arg6[%c0_43, %c0_44] : memref<16x128xf32, #tpu.memory_space<vmem>>, vector<16x128xf32>
    tpu.vector_store %arg6[%c0_43, %c0_44], %83 {strides = array<i32>} : memref<16x128xf32, #tpu.memory_space<vmem>>, vector<16x128xf32>,
    return
  }
  func.func @transform_0(%arg0: i32) -> (i32, i32) {
    %c0_i32 = arith.constant 0 : i32
    %c0_i32_0 = arith.constant 0 : i32
    return %arg0, %c0_i32 : i32, i32
  }
  func.func @transform_1(%arg0: i32) -> (i32, i32) {
    %c0_i32 = arith.constant 0 : i32
    %c0_i32_0 = arith.constant 0 : i32
    %c0_i32_1 = arith.constant 0 : i32
    return %c0_i32, %c0_i32_0 : i32, i32
  }
  func.func @transform_2(%arg0: i32) -> (i32, i32) {
    %c0_i32 = arith.constant 0 : i32
    %c0_i32_0 = arith.constant 0 : i32
    %c0_i32_1 = arith.constant 0 : i32
    return %c0_i32, %c0_i32_0 : i32, i32
  }
  func.func @transform_3(%arg0: i32) -> (i32, i32) {
    %c0_i32 = arith.constant 0 : i32
    %c0_i32_0 = arith.constant 0 : i32
    %c0_i32_1 = arith.constant 0 : i32
    return %c0_i32, %c0_i32_0 : i32, i32
  }
  func.func @transform_4(%arg0: i32) -> (i32, i32) {
    %c0_i32 = arith.constant 0 : i32
    %c0_i32_0 = arith.constant 0 : i32
    %c0_i32_1 = arith.constant 0 : i32
    return %c0_i32, %c0_i32_0 : i32, i32
  }
  func.func @transform_5(%arg0: i32) -> (i32, i32) {
    %c0_i32 = arith.constant 0 : i32
    %c0_i32_0 = arith.constant 0 : i32
    return %arg0, %c0_i32 : i32, i32
  }
}

</mosaic_0001>

<bundles_post_ra>
// kernel: tpu_custom_call.1
= control target key start
LH: loop header
LB: loop body
LE: loop exit
PB: predicated region body
PF: predicated region fallthrough
CT: control target
= control target key end

     0   :  { %10 = vsyncpa [#allocation3], 0  ;;  %s1470_s0 = inlined_call_operand.hbm [shape: bf16[16,128], index: 0, kind: input, shape index: {}]   ;;  %s1471_s1 = inlined_call_operand.hbm [shape: bf16[128,512], index: 1, kind: input, shape index: {}]   ;;  %s1472_s2 = inlined_call_operand.vmem [shape: f32[1,512], index: 2, kind: input, shape index: {}]   ;;  %s1473_s3 = inlined_call_operand.hbm [shape: bf16[512,128], index: 3, kind: input, shape index: {}]   ;;  %s1474_s4 = inlined_call_operand.vmem [shape: f32[1,128], index: 4, kind: input, shape index: {}]   ;;  %s1475_s5 = inlined_call_operand.hbm [shape: f32[16,128], index: 5, kind: output, shape index: {}]  }
   0x1   :  { %11 = vsyncpa [#allocation6], 0 }
   0x2   :  { %12 = vsyncpa [#allocation4], 0  ;;  %s1250_s18 = smov [#allocation5]   ;;  %s1156_s22 = scalar_lea.hbm %s1471_s1, 4096 }
   0x3   :  { %s30_s19 = sshll.u32 %s1250_s18, 4  ;;  %p1157_p0 = scmp.ne.s32.totalorder %s1471_s1, %s1156_s22  ;;  %s31_s19 = int_to_ptr.vmem [resolvable:$true] %s30_s19 }
   0x4   :  { %p1160_p1 = scmp.lt.u32.totalorder %s1156_s22, %s1471_s1 }
   0x6   :  { %p1162_p2 = pnand %p1160_p1, %p1157_p0 }
   0x8   :  { %1165 = shalt.err (!%p1162_p2)
}
   0x9   :  { %s1166_s27 = scalar_lea.vmem %s31_s19, 4096  ;;  %p1171_p4 = scmp.lt.s32.totalorder %s31_s19, %s31_s19 }
   0xa   :  { %p1167_p3 = scmp.ne.s32.totalorder %s31_s19, %s1166_s27  ;;  %p1172_p5 = scmp.lt.s32.totalorder %s1166_s27, %s1166_s27 }
   0xc   :  { %p1173_p6 = por %p1172_p5, %p1171_p4 }
   0xe   :  { %p1174_p7 = pnand %p1173_p6, %p1167_p3 }
  0x10   :  { %1177 = shalt.err (!%p1174_p7)
}
  0x11   :  { %s1251_s28 = smov 256   ;;  %s1252_s29 = smov 16  }
  0x12   :  { %36 = dma.hbm_to_vmem [thread:$0]  %s1471_s1, 4096, %s31_s19, [#allocation6], %s1251_s28, %s1251_s28, %s1252_s29  }
  0x13   :  { %s1253_s7 = smov [#allocation2]   ;;  %s1178_s11 = scalar_lea.hbm %s1470_s0, 128 }
  0x14   :  { %s18_s8 = sshll.u32 %s1253_s7, 4  ;;  %p1179_p8 = scmp.ne.s32.totalorder %s1470_s0, %s1178_s11  ;;  %s19_s8 = int_to_ptr.vmem [resolvable:$true] %s18_s8 }
  0x15   :  { %p1182_p9 = scmp.lt.u32.totalorder %s1178_s11, %s1470_s0 }
  0x17   :  { %p1184_p10 = pnand %p1182_p9, %p1179_p8 }
  0x19   :  { %1187 = shalt.err (!%p1184_p10)
}
  0x1a   :  { %s1188_s16 = scalar_lea.vmem %s19_s8, 128  ;;  %p1193_p12 = scmp.lt.s32.totalorder %s19_s8, %s19_s8 }
  0x1b   :  { %p1189_p11 = scmp.ne.s32.totalorder %s19_s8, %s1188_s16  ;;  %p1194_p13 = scmp.lt.s32.totalorder %s1188_s16, %s1188_s16 }
  0x1d   :  { %p1195_p0 = por %p1194_p13, %p1193_p12 }
  0x1f   :  { %p1196_p1 = pnand %p1195_p0, %p1189_p11 }
  0x21   :  { %1199 = shalt.err (!%p1196_p1)
}
  0x22   :  { %s1254_s1 = smov 64   ;;  %s1255_s17 = smov 4  }
  0x23   :  { %24 = dma.hbm_to_vmem [thread:$0]  %s1470_s0, 128, %s19_s8, [#allocation3], %s1254_s1, %s1254_s1, %s1255_s17  }
  0x24   :  { %s1256_s20 = smov [#allocation7]   ;;  %s1200_s24 = scalar_lea.hbm %s1473_s3, 4096 }
  0x25   :  { %s44_s21 = sshll.u32 %s1256_s20, 4  ;;  %p1201_p2 = scmp.ne.s32.totalorder %s1473_s3, %s1200_s24  ;;  %s45_s21 = int_to_ptr.vmem [resolvable:$true] %s44_s21 }
  0x26   :  { %p1204_p3 = scmp.lt.u32.totalorder %s1200_s24, %s1473_s3 }
  0x28   :  { %p1206_p4 = pnand %p1204_p3, %p1201_p2 }
  0x2a   :  { %1209 = shalt.err (!%p1206_p4)
}
  0x2b   :  { %s1210_s29 = scalar_lea.vmem %s45_s21, 4096  ;;  %p1215_p6 = scmp.lt.s32.totalorder %s45_s21, %s45_s21 }
  0x2c   :  { %p1211_p5 = scmp.ne.s32.totalorder %s45_s21, %s1210_s29  ;;  %p1216_p7 = scmp.lt.s32.totalorder %s1210_s29, %s1210_s29 }
  0x2e   :  { %p1217_p8 = por %p1216_p7, %p1215_p6 }
  0x30   :  { %p1218_p9 = pnand %p1217_p8, %p1211_p5 }
  0x32   :  { %1221 = shalt.err (!%p1218_p9)
}
  0x33   :  { %50 = dma.hbm_to_vmem [thread:$0]  %s1473_s3, 4096, %s45_s21, [#allocation6], %s1254_s1, %s1254_s1, %s1255_s17  }
  0x34   :  { %1244 = dma.done.wait [#allocation3], 128  }
  0x35   :  { %1245 = vsyncadd [#allocation3], 4294967168 }
  0x36   :  { %1246 = dma.done.wait [#allocation6], 8192  }
  0x37   :  { %1247 = vsyncadd [#allocation6], 4294959104  ;;  %v1257_v0 = vmov 0   ;;  %v1043_v1 = vld [vmem:[#allocation5 + $0x4] ss:$16 sps:$4 sm:$0xff]   ;;  %v1067_v18 = vld [vmem:[#allocation2] sm:$0xff]   ;;  %v92_v51 = vlaneseq }
  0x38   :  { %220 = vmatprep.mubr.bf16.mxu0 %v1257_v0  ;;  %v1045_v2 = vld [vmem:[#allocation5] ss:$16 sps:$4 sm:$0xff]   ;;  %188 = vmatprep.subr.bf16.mxu0 %v1043_v1  ;;  %v1046_v3 = vld [vmem:[#allocation5 + $0x24] ss:$16 sps:$4 sm:$0xff]   ;;  %v1070_v17 = vld [vmem:[#allocation5 + $0xc] ss:$16 sps:$4 sm:$0xff]  }
  0x39   :  { %189 = vmatpush1.bf16.msra.mxu0 %v1045_v2  ;;  %v1048_v4 = vld [vmem:[#allocation5 + $0x20] ss:$16 sps:$4 sm:$0xff]   ;;  %v1049_v5 = vld [vmem:[#allocation5 + $0x44] ss:$16 sps:$4 sm:$0xff]   ;;  %v1068_v19 = vld [vmem:[#allocation5 + $0x8] ss:$16 sps:$4 sm:$0xff]  }
  0x3a   :  { %190 = vmatprep.subr.bf16.mxu0 %v1046_v3  ;;  %v1051_v6 = vld [vmem:[#allocation5 + $0x40] ss:$16 sps:$4 sm:$0xff]   ;;  %v1052_v7 = vld [vmem:[#allocation5 + $0x64] ss:$16 sps:$4 sm:$0xff]   ;;  %v1073_v20 = vld [vmem:[#allocation5 + $0x2c] ss:$16 sps:$4 sm:$0xff]  }
  0x3b   :  { %v1054_v8 = vld [vmem:[#allocation5 + $0x60] ss:$16 sps:$4 sm:$0xff]   ;;  %v1055_v9 = vld [vmem:[#allocation5 + $0x84] ss:$16 sps:$4 sm:$0xff]   ;;  %v1071_v21 = vld [vmem:[#allocation5 + $0x28] ss:$16 sps:$4 sm:$0xff]  }
  0x3c   :  { %v1057_v10 = vld [vmem:[#allocation5 + $0x80] ss:$16 sps:$4 sm:$0xff]   ;;  %v1058_v11 = vld [vmem:[#allocation5 + $0xa4] ss:$16 sps:$4 sm:$0xff]   ;;  %v1076_v22 = vld [vmem:[#allocation5 + $0x4c] ss:$16 sps:$4 sm:$0xff]  }
  0x3d   :  { %191 = vmatpush1.bf16.msra.mxu0 %v1048_v4  ;;  %v1060_v12 = vld [vmem:[#allocation5 + $0xa0] ss:$16 sps:$4 sm:$0xff]   ;;  %v1061_v13 = vld [vmem:[#allocation5 + $0xc4] ss:$16 sps:$4 sm:$0xff]   ;;  %v1074_v23 = vld [vmem:[#allocation5 + $0x48] ss:$16 sps:$4 sm:$0xff]  }
  0x3e   :  { %192 = vmatprep.subr.bf16.mxu0 %v1049_v5  ;;  %v1063_v14 = vld [vmem:[#allocation5 + $0xc0] ss:$16 sps:$4 sm:$0xff]   ;;  %v1064_v15 = vld [vmem:[#allocation5 + $0xe4] ss:$16 sps:$4 sm:$0xff]   ;;  %v1079_v24 = vld [vmem:[#allocation5 + $0x6c] ss:$16 sps:$4 sm:$0xff]  }
  0x3f   :  { %v1066_v16 = vld [vmem:[#allocation5 + $0xe0] ss:$16 sps:$4 sm:$0xff]   ;;  %v1077_v25 = vld [vmem:[#allocation5 + $0x68] ss:$16 sps:$4 sm:$0xff]   ;;  %v1082_v26 = vld [vmem:[#allocation5 + $0x8c] ss:$16 sps:$4 sm:$0xff]  }
  0x40   :  { %v1080_v27 = vld [vmem:[#allocation5 + $0x88] ss:$16 sps:$4 sm:$0xff]   ;;  %v1085_v28 = vld [vmem:[#allocation5 + $0xac] ss:$16 sps:$4 sm:$0xff]   ;;  %v1092_v34 = vld [vmem:[#allocation7 + $0x40] sm:$0xff]   ;;  %v93_v52 = vshrl.u32 %v92_v51, 7 }
  0x41   :  { %193 = vmatpush1.bf16.msra.mxu0 %v1051_v6  ;;  %v1083_v29 = vld [vmem:[#allocation5 + $0xa8] ss:$16 sps:$4 sm:$0xff]   ;;  %v1088_v30 = vld [vmem:[#allocation5 + $0xcc] ss:$16 sps:$4 sm:$0xff]   ;;  %v1093_v35 = vld [vmem:[#allocation7] sm:$0xff]   ;;  %988 = vmatprep.subr.bf16.mxu1 %v1092_v34  ;;  %s1258_s10 = smov [#allocation8]  }
  0x42   :  { %194 = vmatprep.subr.bf16.mxu0 %v1052_v7  ;;  %v1086_v31 = vld [vmem:[#allocation5 + $0xc8] ss:$16 sps:$4 sm:$0xff]   ;;  %v1091_v32 = vld [vmem:[#allocation5 + $0xec] ss:$16 sps:$4 sm:$0xff]   ;;  %989 = vmatpush3.bf16.msra.mxu1 %v1093_v35  ;;  %v1096_v38 = vld [vmem:[#allocation7 + $0x50] sm:$0xff]   ;;  %v94_v53 = vsub.s32 0, %v93_v52 }
  0x43   :  { %v1089_v33 = vld [vmem:[#allocation5 + $0xe8] ss:$16 sps:$4 sm:$0xff]   ;;  %v1097_v39 = vld [vmem:[#allocation7 + $0x10] sm:$0xff]   ;;  %v1100_v42 = vld [vmem:[#allocation7 + $0x60] sm:$0xff]   ;;  %v98_v55 = vsub.s32 1, %v93_v52  ;;  %s909_s11 = sshll.u32 %s1258_s10, 4  ;;  %s910_s11 = int_to_ptr.vmem [resolvable:$true] %s909_s11 }
  0x44   :  { %v1094_v36 = vld [vmem:[#allocation7 + $0x48] sm:$0xff]   ;;  %v1098_v40 = vld [vmem:[#allocation7 + $0x58] sm:$0xff]   ;;  %v1101_v43 = vld [vmem:[#allocation7 + $0x20] sm:$0xff]   ;;  %s1222_s12 = scalar_lea.vmem %s910_s11, 256  ;;  %p1227_p11 = scmp.lt.s32.totalorder %s910_s11, %s910_s11 }
  0x45   :  { %195 = vmatpush1.bf16.msra.mxu0 %v1054_v8  ;;  %v1095_v37 = vld [vmem:[#allocation7 + $0x8] sm:$0xff]   ;;  %990 = vmatprep.subr.bf16.mxu1 %v1094_v36  ;;  %v1099_v41 = vld [vmem:[#allocation7 + $0x18] sm:$0xff]   ;;  %v1104_v46 = vld [vmem:[#allocation7 + $0x70] sm:$0xff]   ;;  %p1223_p10 = scmp.ne.s32.totalorder %s910_s11, %s1222_s12  ;;  %p1228_p12 = scmp.lt.s32.totalorder %s1222_s12, %s1222_s12 }
  0x46   :  { %196 = vmatprep.subr.bf16.mxu0 %v1055_v9  ;;  %991 = vmatpush3.bf16.msra.mxu1 %v1095_v37  ;;  %v1102_v44 = vld [vmem:[#allocation7 + $0x68] sm:$0xff]   ;;  %v1105_v47 = vld [vmem:[#allocation7 + $0x30] sm:$0xff]   ;;  %v1106_v48 = vld [vmem:[#allocation7 + $0x78] sm:$0xff]  }
  0x47   :  { %992 = vmatprep.subr.bf16.mxu1 %v1096_v38  ;;  %v1103_v45 = vld [vmem:[#allocation7 + $0x28] sm:$0xff]   ;;  %v1107_v49 = vld [vmem:[#allocation7 + $0x38] sm:$0xff]   ;;  %v1108_v50 = vld [vmem:[#allocation7 + $0xc0] sm:$0xff]   ;;  %p1229_p13 = por %p1228_p12, %p1227_p11 }
  0x48   :  { %v90_v54 = vld [vmem:[%s1472_s2] sm:$0x3] }
  0x49   :  { %197 = vmatpush1.bf16.msra.mxu0 %v1057_v10  ;;  %v95_v56 = vrot.slane %v90_v54, %v94_v53  ;;  %v99_v57 = vrot.slane %v90_v54, %v98_v55  ;;  %p1230_p0 = pnand %p1229_p13, %p1223_p10 }
  0x4a   :  { %198 = vmatprep.subr.bf16.mxu0 %v1058_v11  ;;  %993 = vmatpush3.bf16.msra.mxu1 %v1097_v39 }
  0x4b   :  { %994 = vmatprep.subr.bf16.mxu1 %v1098_v40 }
  0x4d   :  { %199 = vmatpush1.bf16.msra.mxu0 %v1060_v12 }
  0x4e   :  { %200 = vmatprep.subr.bf16.mxu0 %v1061_v13  ;;  %995 = vmatpush3.bf16.msra.mxu1 %v1099_v41 }
  0x4f   :  { %996 = vmatprep.subr.bf16.mxu1 %v1100_v42 }
  0x51   :  { %201 = vmatpush1.bf16.msra.mxu0 %v1063_v14 }
  0x52   :  { %202 = vmatprep.subr.bf16.mxu0 %v1064_v15  ;;  %997 = vmatpush3.bf16.msra.mxu1 %v1101_v43 }
  0x53   :  { %998 = vmatprep.subr.bf16.mxu1 %v1102_v44 }
  0x55   :  { %203 = vmatpush1.bf16.msra.mxu0 %v1066_v16 }
  0x56   :  { %600 = vmatprep.subr.bf16.mxu0 %v1070_v17  ;;  %999 = vmatpush3.bf16.msra.mxu1 %v1103_v45 }
  0x57   :  { %1000 = vmatprep.subr.bf16.mxu1 %v1104_v46 }
  0x58   :  { %221 = vmatmul.mubr.bf16.vlgmr.msra.gmra.mrb[0].mxu0 %v1067_v18 }
  0x59   :  { %601 = vmatpush1.bf16.msra.mxu0 %v1068_v19  ;;  %632 = vmatprep.mubr.bf16.mxu0 %v1257_v0 }
  0x5a   :  { %602 = vmatprep.subr.bf16.mxu0 %v1073_v20  ;;  %1001 = vmatpush3.bf16.msra.mxu1 %v1105_v47 }
  0x5b   :  { %1002 = vmatprep.subr.bf16.mxu1 %v1106_v48 }
  0x5d   :  { %603 = vmatpush1.bf16.msra.mxu0 %v1071_v21 }
  0x5e   :  { %604 = vmatprep.subr.bf16.mxu0 %v1076_v22  ;;  %1003 = vmatpush3.bf16.msra.mxu1 %v1107_v49 }
  0x5f   :  { %1010 = vmatprep.subr.bf16.mxu1 %v1108_v50 }
  0x61   :  { %605 = vmatpush1.bf16.msra.mxu0 %v1074_v23 }
  0x62   :  { %606 = vmatprep.subr.bf16.mxu0 %v1079_v24 }
  0x65   :  { %607 = vmatpush1.bf16.msra.mxu0 %v1077_v25 }
  0x66   :  { %608 = vmatprep.subr.bf16.mxu0 %v1082_v26 }
  0x69   :  { %609 = vmatpush1.bf16.msra.mxu0 %v1080_v27 }
  0x6a   :  { %610 = vmatprep.subr.bf16.mxu0 %v1085_v28  ;;  %v508_v28 = vld [vmem:[%s1472_s2 + $0x2] sm:$0x3] }
  0x6b   :  { %v513_v39 = vrot.slane %v508_v28, %v94_v53  ;;  %v517_v40 = vrot.slane %v508_v28, %v98_v55 }
  0x6d   :  { %611 = vmatpush1.bf16.msra.mxu0 %v1083_v29 }
  0x6e   :  { %612 = vmatprep.subr.bf16.mxu0 %v1088_v30 }
  0x71   :  { %613 = vmatpush1.bf16.msra.mxu0 %v1086_v31 }
  0x72   :  { %614 = vmatprep.subr.bf16.mxu0 %v1091_v32 }
  0x75   :  { %615 = vmatpush1.bf16.msra.mxu0 %v1089_v33 }
  0x78   :  { %633 = vmatmul.mubr.bf16.vlgmr.msra.gmra.mrb[4].mxu0 %v1067_v18 }
 0x12b   :  { %v222_v58 = vpop.f32.mrb[0].mxu0 }
 0x12c   :  { %v1330_v59 = vadd.f32 %v222_v58, %v95_v56  ;;  %v224_v60 = vpop.f32.mrb[1].mxu0 }
 0x12d   :  { %v1332_v61 = vadd.f32 %v224_v60, %v99_v57  ;;  %v226_v62 = vpop.f32.mrb[2].mxu0 }
 0x12e   :  { %v231_v63 = vand.u32 2147483647, %v1330_v59  ;;  %v1335_v0 = vadd.f32 %v226_v62, %v95_v56  ;;  %v228_v1 = vpop.f32.mrb[3].mxu0  ;;  %v291_v17 = vmul.f32 %v1330_v59, %v1330_v59 }
 0x12f   :  { %v232_v2 = vand.u32 2147483647, %v1332_v61  ;;  %v1338_v3 = vadd.f32 %v228_v1, %v99_v57  ;;  %v292_v27 = vmul.f32 %v1332_v61, %v1332_v61 }
 0x130   :  { %v235_v4 = vmul.f32 0.23164189, %v231_v63  ;;  %v233_v5 = vand.u32 2147483647, %v1335_v0  ;;  %v293_v21 = vmul.f32 %v1335_v0, %v1335_v0  ;;  %v295_v26 = vmul.f32 -0.5, %v291_v17 }
 0x131   :  { %v236_v6 = vmul.f32 0.23164189, %v232_v2  ;;  %v234_v7 = vand.u32 2147483647, %v1338_v3  ;;  %v294_v36 = vmul.f32 %v1338_v3, %v1338_v3  ;;  %v296_v38 = vmul.f32 -0.5, %v292_v27 }
 0x132   :  { %v239_v8 = vadd.f32 1.0, %v235_v4  ;;  %v237_v9 = vmul.f32 0.23164189, %v233_v5  ;;  %v297_v32 = vmul.f32 -0.5, %v293_v21  ;;  %v299_v42 = vmul.f32 1.442695, %v295_v26 }
 0x133   :  { %v240_v10 = vadd.f32 1.0, %v236_v6  ;;  %v238_v11 = vmul.f32 0.23164189, %v234_v7  ;;  %v298_v49 = vmul.f32 -0.5, %v294_v36  ;;  %v301_v51 = vmul.f32 1.442695, %v296_v38 }
 0x134   :  { %1124 = vrcp.f32 %v239_v8  ;;  %v241_v12 = vadd.f32 1.0, %v237_v9  ;;  %v303_v45 = vmul.f32 1.442695, %v297_v32  ;;  %v285_v36 = vmax.f32 %v1335_v0, 0.0 }
 0x135   :  { %1126 = vrcp.f32 %v240_v10  ;;  %v242_v13 = vadd.f32 1.0, %v238_v11  ;;  %v305_v8 = vmul.f32 1.442695, %v298_v49  ;;  %v286_v49 = vmax.f32 %v1338_v3, 0.0 }
 0x136   :  { %1128 = vrcp.f32 %v241_v12 }
 0x137   :  { %1130 = vrcp.f32 %v242_v13 }
 0x138   :  { %1132 = vpow2.f32 %v299_v42 }
 0x139   :  { %1134 = vpow2.f32 %v303_v45 }
 0x13a   :  { %1136 = vpow2.f32 %v301_v51 }
 0x13b   :  { %1138 = vpow2.f32 %v305_v8 }
 0x13e   :  { %v1125_v14 = vpop.eup %1124 }
 0x13f   :  { %v247_v15 = vmul.f32 0.5307027, %v1125_v14  ;;  %v1350_v16 = vpop.eup %1126 }
 0x140   :  { %v248_v19 = vmul.f32 0.5307027, %v1350_v16  ;;  %v1129_v20 = vpop.eup %1128 }
 0x141   :  { %v251_v18 = vadd.f32 -0.72657603, %v247_v15  ;;  %v249_v23 = vmul.f32 0.5307027, %v1129_v20  ;;  %v1357_v25 = vpop.eup %1130 }
 0x142   :  { %v252_v24 = vadd.f32 -0.72657603, %v248_v19  ;;  %v250_v31 = vmul.f32 0.5307027, %v1357_v25 }
 0x143   :  { %v255_v22 = vmul.f32 %v1125_v14, %v251_v18  ;;  %v253_v30 = vadd.f32 -0.72657603, %v249_v23 }
 0x144   :  { %v256_v33 = vmul.f32 %v1350_v16, %v252_v24  ;;  %v254_v37 = vadd.f32 -0.72657603, %v250_v31  ;;  %v1133_v31 = vpop.eup %1132 }
 0x145   :  { %v259_v29 = vadd.f32 0.7107069, %v255_v22  ;;  %v257_v35 = vmul.f32 %v1129_v20, %v253_v30 }
 0x146   :  { %v258_v44 = vmul.f32 %v1357_v25, %v254_v37  ;;  %v260_v46 = vadd.f32 0.7107069, %v256_v33  ;;  %v1135_v33 = vpop.eup %1134 }
 0x147   :  { %v263_v34 = vmul.f32 %v1125_v14, %v259_v29  ;;  %v261_v43 = vadd.f32 0.7107069, %v257_v35 }
 0x148   :  { %v262_v56 = vadd.f32 0.7107069, %v258_v44  ;;  %v264_v4 = vmul.f32 %v1350_v16, %v260_v46 }
 0x149   :  { %v267_v41 = vadd.f32 -0.14224836, %v263_v34  ;;  %v265_v48 = vmul.f32 %v1129_v20, %v261_v43  ;;  %v1137_v43 = vpop.eup %1136 }
 0x14a   :  { %v266_v13 = vmul.f32 %v1357_v25, %v262_v56  ;;  %v268_v21 = vadd.f32 -0.14224836, %v264_v4 }
 0x14b   :  { %v271_v47 = vmul.f32 %v1125_v14, %v267_v41  ;;  %v634_v50 = vpop.f32.mrb[4].mxu0  ;;  %v269_v53 = vadd.f32 -0.14224836, %v265_v48 }
 0x14c   :  { %v1369_v52 = vadd.f32 %v634_v50, %v513_v39  ;;  %v636_v54 = vpop.f32.mrb[5].mxu0  ;;  %v270_v27 = vadd.f32 -0.14224836, %v266_v13  ;;  %v272_v30 = vmul.f32 %v1350_v16, %v268_v21  ;;  %v1110_v13 = vld [vmem:[#allocation7 + $0xc8] sm:$0xff]  }
 0x14d   :  { %v275_v57 = vadd.f32 0.1274148, %v271_v47  ;;  %v1371_v55 = vadd.f32 %v636_v54, %v517_v40  ;;  %v638_v58 = vpop.f32.mrb[6].mxu0  ;;  %v273_v6 = vmul.f32 %v1129_v20, %v269_v53 }
 0x14e   :  { %v643_v60 = vand.u32 2147483647, %v1369_v52  ;;  %v1374_v62 = vadd.f32 %v638_v58, %v513_v39  ;;  %v640_v1 = vpop.f32.mrb[7].mxu0  ;;  %v274_v32 = vmul.f32 %v1357_v25, %v270_v27  ;;  %v276_v34 = vadd.f32 0.1274148, %v272_v30  ;;  %v1111_v30 = vld [vmem:[#allocation7 + $0x88] sm:$0xff]  }
 0x14f   :  { %v644_v9 = vand.u32 2147483647, %v1371_v55  ;;  %v279_v10 = vmul.f32 %v1125_v14, %v275_v57  ;;  %v277_v15 = vadd.f32 0.1274148, %v273_v6  ;;  %v1386_v23 = vadd.f32 %v640_v1, %v517_v40 }
 0x150   :  { %v647_v11 = vmul.f32 0.23164189, %v643_v60  ;;  %v645_v12 = vand.u32 2147483647, %v1374_v62  ;;  %v278_v37 = vadd.f32 0.1274148, %v274_v32  ;;  %v280_v39 = vmul.f32 %v1350_v16, %v276_v34 }
 0x151   :  { %v648_v17 = vmul.f32 0.23164189, %v644_v9  ;;  %v281_v22 = vmul.f32 %v1129_v20, %v277_v15  ;;  %v287_v24 = vmul.f32 %v279_v10, %v231_v63  ;;  %v646_v29 = vand.u32 2147483647, %v1386_v23  ;;  %v1109_v10 = vld [vmem:[#allocation7 + $0x80] sm:$0xff]   ;;  %v1112_v32 = vld [vmem:[#allocation7 + $0xd0] sm:$0xff]  }
 0x152   :  { %v651_v18 = vadd.f32 1.0, %v647_v11  ;;  %v649_v19 = vmul.f32 0.23164189, %v645_v12  ;;  %v283_v63 = vmax.f32 %v1330_v59, 0.0  ;;  %v282_v40 = vmul.f32 %v1357_v25, %v278_v37  ;;  %v1139_v59 = vpop.eup %1138 }
 0x153   :  { %v652_v14 = vadd.f32 1.0, %v648_v17  ;;  %v289_v28 = vmul.f32 %v281_v22, %v233_v5  ;;  %v650_v20 = vmul.f32 0.23164189, %v646_v29  ;;  %v307_v35 = vmul.f32 %v1133_v31, %v287_v24 }
 0x154   :  { %1140 = vrcp.f32 %v651_v18  ;;  %v653_v26 = vadd.f32 1.0, %v649_v19  ;;  %v288_v44 = vmul.f32 %v280_v39, %v232_v2  ;;  %v290_v45 = vmul.f32 %v282_v40, %v234_v7  ;;  %v1113_v40 = vld [vmem:[#allocation7 + $0x90] sm:$0xff]  }
 0x155   :  { %1142 = vrcp.f32 %v652_v14  ;;  %v654_v5 = vadd.f32 1.0, %v650_v20  ;;  %v309_v38 = vmul.f32 %v1135_v33, %v289_v28  ;;  %v311_v41 = vsub.f32 %v283_v63, %v307_v35 }
 0x156   :  { %1144 = vrcp.f32 %v653_v26  ;;  %v703_v47 = vmul.f32 %v1369_v52, %v1369_v52  ;;  %v308_v16 = vmul.f32 %v1137_v43, %v288_v44  ;;  %v284_v25 = vmax.f32 %v1332_v61, 0.0 }
 0x157   :  { %1146 = vrcp.f32 %v654_v5  ;;  %v313_v42 = vsub.f32 %v285_v36, %v309_v38  ;;  %v310_v50 = vmul.f32 %v1139_v59, %v290_v45  ;;  %v704_v2 = vmul.f32 %v1371_v55, %v1371_v55 }
 0x158   :  { %v705_v7 = vmul.f32 %v1374_v62, %v1374_v62  ;;  %v312_v57 = vsub.f32 %v284_v25, %v308_v16  ;;  %v707_v1 = vmul.f32 -0.5, %v703_v47  ;;  %v706_v61 = vmul.f32 %v1386_v23, %v1386_v23 }
 0x159   :  { %v317_v46 = vpack.c.bf16 %v313_v42, %v311_v41  ;;  %v314_v53 = vsub.f32 %v286_v49, %v310_v50  ;;  %v708_v19 = vmul.f32 -0.5, %v704_v2  ;;  %v1114_v42 = vld [vmem:[#allocation7 + $0xd8] sm:$0xff]   ;;  %v1116_v49 = vld [vmem:[#allocation7 + $0xe0] sm:$0xff]  }
 0x15a   :  { %v709_v11 = vmul.f32 -0.5, %v705_v7  ;;  %v711_v22 = vmul.f32 1.442695, %v707_v1  ;;  %v710_v28 = vmul.f32 -0.5, %v706_v61  ;;  %v1118_v61 = vld [vmem:[#allocation7 + $0xe8] sm:$0xff]  }
 0x15b   :  { %v318_v8 = vpack.c.bf16 %v314_v53, %v312_v57  ;;  %v713_v34 = vmul.f32 1.442695, %v708_v19 }
 0x15c   :  { %v715_v31 = vmul.f32 1.442695, %v709_v11  ;;  %1148 = vpow2.f32 %v711_v22  ;;  %v717_v39 = vmul.f32 1.442695, %v710_v28  ;;  %v1119_v11 = vld [vmem:[#allocation7 + $0xa8] sm:$0xff]  }
 0x15d   :  { %479 = vmatprep.mubr.bf16.mxu1 %v318_v8  ;;  %v695_v8 = vmax.f32 %v1369_v52, 0.0  ;;  %v1121_v52 = vld [vmem:[#allocation7 + $0xb0] sm:$0xff]  }
 0x15e   :  { %v1405_v0 = vpop.eup %1140  ;;  %480 = vmatmul.mubr.bf16.vlgmr.msra.gmra.mrb[0].mxu1 %v317_v46  ;;  %1150 = vpow2.f32 %v715_v31 }
 0x15f   :  { %v659_v48 = vmul.f32 0.5307027, %v1405_v0  ;;  %v1412_v51 = vpop.eup %1142  ;;  %1011 = vmatpush3.bf16.msra.mxu1 %v1109_v10  ;;  %1152 = vpow2.f32 %v713_v34 }
 0x160   :  { %v660_v56 = vmul.f32 0.5307027, %v1412_v51  ;;  %v1419_v58 = vpop.eup %1144  ;;  %1012 = vmatprep.subr.bf16.mxu1 %v1110_v13  ;;  %1154 = vpow2.f32 %v717_v39  ;;  %v1120_v13 = vld [vmem:[#allocation7 + $0xf0] sm:$0xff]  }
 0x161   :  { %v663_v54 = vadd.f32 -0.72657603, %v659_v48  ;;  %v661_v6 = vmul.f32 0.5307027, %v1419_v58  ;;  %v1425_v15 = vpop.eup %1146  ;;  %v1115_v48 = vld [vmem:[#allocation7 + $0x98] sm:$0xff]  }
 0x162   :  { %v664_v4 = vadd.f32 -0.72657603, %v660_v56  ;;  %v662_v14 = vmul.f32 0.5307027, %v1425_v15 }
 0x163   :  { %v667_v3 = vmul.f32 %v1405_v0, %v663_v54  ;;  %v665_v21 = vadd.f32 -0.72657603, %v661_v6  ;;  %1013 = vmatpush3.bf16.msra.mxu1 %v1111_v30 }
 0x164   :  { %v668_v18 = vmul.f32 %v1412_v51, %v664_v4  ;;  %v666_v20 = vadd.f32 -0.72657603, %v662_v14  ;;  %1014 = vmatprep.subr.bf16.mxu1 %v1112_v32  ;;  %v1122_v14 = vld [vmem:[#allocation7 + $0xf8] sm:$0xff]  }
 0x165   :  { %v671_v17 = vadd.f32 0.7107069, %v667_v3  ;;  %v669_v27 = vmul.f32 %v1419_v58, %v665_v21  ;;  %v696_v21 = vmax.f32 %v1371_v55, 0.0  ;;  %v922_v32 = vld [vmem:[%s1474_s4] ss:$0 sm:$0xff] }
 0x166   :  { %v672_v26 = vadd.f32 0.7107069, %v668_v18  ;;  %v670_v36 = vmul.f32 %v1425_v15, %v666_v20  ;;  %v1149_v57 = vpop.eup %1148 }
 0x167   :  { %v675_v24 = vmul.f32 %v1405_v0, %v671_v17  ;;  %v673_v35 = vadd.f32 0.7107069, %v669_v27  ;;  %1015 = vmatpush3.bf16.msra.mxu1 %v1113_v40 }
 0x168   :  { %v676_v63 = vmul.f32 %v1412_v51, %v672_v26  ;;  %v674_v41 = vadd.f32 0.7107069, %v670_v36  ;;  %1016 = vmatprep.subr.bf16.mxu1 %v1114_v42  ;;  %v1151_v4 = vpop.eup %1150 }
 0x169   :  { %v679_v33 = vadd.f32 -0.14224836, %v675_v24  ;;  %v677_v38 = vmul.f32 %v1419_v58, %v673_v35  ;;  %v1153_v6 = vpop.eup %1152 }
 0x16a   :  { %v680_v37 = vadd.f32 -0.14224836, %v676_v63  ;;  %v678_v45 = vmul.f32 %v1425_v15, %v674_v41  ;;  %v1155_v18 = vpop.eup %1154 }
 0x16b   :  { %v683_v5 = vmul.f32 %v1405_v0, %v679_v33  ;;  %v681_v59 = vadd.f32 -0.14224836, %v677_v38  ;;  %1017 = vmatpush3.bf16.msra.mxu1 %v1115_v48 }
 0x16c   :  { %v684_v44 = vmul.f32 %v1412_v51, %v680_v37  ;;  %v682_v25 = vadd.f32 -0.14224836, %v678_v45  ;;  %1018 = vmatprep.subr.bf16.mxu1 %v1116_v49 }
 0x16d   :  { %v687_v43 = vadd.f32 0.1274148, %v683_v5  ;;  %v685_v16 = vmul.f32 %v1419_v58, %v681_v59 }
 0x16e   :  { %v688_v47 = vadd.f32 0.1274148, %v684_v44  ;;  %v686_v54 = vmul.f32 %v1425_v15, %v682_v25 }
 0x16f   :  { %v691_v46 = vmul.f32 %v1405_v0, %v687_v43  ;;  %v689_v7 = vadd.f32 0.1274148, %v685_v16  ;;  %v1117_v0 = vld [vmem:[#allocation7 + $0xa0] sm:$0xff]  }
 0x170   :  { %v692_v2 = vmul.f32 %v1412_v51, %v688_v47  ;;  %v690_v1 = vadd.f32 0.1274148, %v686_v54  ;;  %1019 = vmatpush3.bf16.msra.mxu1 %v1117_v0 }
 0x171   :  { %v699_v50 = vmul.f32 %v691_v46, %v643_v60  ;;  %v693_v56 = vmul.f32 %v1419_v58, %v689_v7  ;;  %v697_v58 = vmax.f32 %v1374_v62, 0.0  ;;  %1020 = vmatprep.subr.bf16.mxu1 %v1118_v61 }
 0x172   :  { %v700_v53 = vmul.f32 %v692_v2, %v644_v9  ;;  %v694_v51 = vmul.f32 %v1425_v15, %v690_v1  ;;  %v698_v15 = vmax.f32 %v1386_v23, 0.0 }
 0x173   :  { %v719_v3 = vmul.f32 %v1149_v57, %v699_v50  ;;  %v701_v60 = vmul.f32 %v693_v56, %v645_v12 }
 0x174   :  { %v702_v9 = vmul.f32 %v694_v51, %v646_v29  ;;  %v720_v17 = vmul.f32 %v1153_v6, %v700_v53  ;;  %1021 = vmatpush3.bf16.msra.mxu1 %v1119_v11  ;;  %v1123_v29 = vld [vmem:[#allocation7 + $0xb8] sm:$0xff]  }
 0x175   :  { %v721_v10 = vmul.f32 %v1151_v4, %v701_v60  ;;  %v723_v19 = vsub.f32 %v695_v8, %v719_v3  ;;  %1022 = vmatprep.subr.bf16.mxu1 %v1120_v13 }
 0x176   :  { %v722_v22 = vmul.f32 %v1155_v18, %v702_v9  ;;  %v724_v24 = vsub.f32 %v696_v21, %v720_v17 }
 0x177   :  { %v725_v12 = vsub.f32 %v697_v58, %v721_v10 }
 0x178   :  { %v726_v26 = vsub.f32 %v698_v15, %v722_v22  ;;  %1023 = vmatpush3.bf16.msra.mxu1 %v1121_v52 }
 0x179   :  { %v729_v62 = vpack.c.bf16 %v725_v12, %v723_v19  ;;  %1024 = vmatprep.subr.bf16.mxu1 %v1122_v14 }
 0x17a   :  { %v730_v27 = vpack.c.bf16 %v726_v26, %v724_v24 }
 0x17c   :  { %891 = vmatprep.mubr.bf16.mxu1 %v730_v27  ;;  %1025 = vmatpush3.bf16.msra.mxu1 %v1123_v29 }
 0x17f   :  { %892 = vmatmul.mubr.bf16.vlgmr.msra.gmra.mrb[4].mxu1 %v729_v62 }
 0x231   :  { %v1004_v28 = vpop.f32.mrb[0].mxu1 }
 0x232   :  { %v1005_v30 = vpop.f32.mrb[1].mxu1 }
 0x233   :  { %v1006_v55 = vadd.f32 %v1005_v30, %v1004_v28  ;;  %v1007_v31 = vpop.f32.mrb[2].mxu1 }
 0x234   :  { %v1008_v23 = vpop.f32.mrb[3].mxu1 }
 0x235   :  { %v1009_v20 = vadd.f32 %v1008_v23, %v1007_v31  ;;  %v488_v34 = vadd.f32 %v1006_v55, %v922_v32 }
 0x237   :  { %v489_v37 = vadd.f32 %v1009_v20, %v922_v32 }
 0x252   :  { %v1026_v33 = vpop.f32.mrb[4].mxu1 }
 0x253   :  { %v1027_v63 = vpop.f32.mrb[5].mxu1 }
 0x254   :  { %v1028_v35 = vadd.f32 %v1027_v63, %v1026_v33  ;;  %v1029_v36 = vpop.f32.mrb[6].mxu1 }
 0x255   :  { %v1030_v5 = vpop.f32.mrb[7].mxu1 }
 0x256   :  { %v900_v38 = vadd.f32 %v1028_v35, %v488_v34  ;;  %v1031_v39 = vadd.f32 %v1030_v5, %v1029_v36 }
 0x258   :  { %902 = vst [vmem:[#allocation8] sm:$0xff] %v900_v38  ;;  %v901_v40 = vadd.f32 %v1031_v39, %v489_v37 }
 0x25a   :  { %903 = vst [vmem:[#allocation8 + $0x8] sm:$0xff] %v901_v40 }
 0x25b   :  { %1233 = shalt.err (!%p1230_p0)
}
 0x25c   :  { %s1234_s14 = scalar_lea.hbm %s1475_s5, 256 }
 0x25d   :  { %p1235_p1 = scmp.ne.s32.totalorder %s1475_s5, %s1234_s14  ;;  %p1238_p2 = scmp.lt.u32.totalorder %s1234_s14, %s1475_s5 }
 0x25f   :  { %p1240_p3 = pnand %p1238_p2, %p1235_p1 }
 0x261   :  { %1243 = shalt.err (!%p1240_p3)
}
 0x262   :  { %s1259_s18 = smov 128   ;;  %s1260_s19 = smov 8  }
 0x263   :  { %915 = dma.vmem_to_hbm [thread:$0]  %s910_s11, 256, %s1475_s5, [#allocation4], %s1259_s18, %s1259_s18, %s1260_s19  }
 0x264   :  { %1248 = dma.done.wait [#allocation4], 256  }
 0x265   :  { %1249 = vsyncadd [#allocation4], 4294967040 }
 0x266   :  { %919 = vsyncpa [#allocation3], 1 }
 0x267   :  { %920 = vsyncpa [#allocation6], 1 }
 0x268   :  { %921 = vsyncpa [#allocation4], 1 }

</bundles_post_ra>
